<compile_context>
chip_gen: v6e
topology: v6e:2x2x1
jax: 0.10.0
libtpu: 0.0.40
codegen_flags: <defaults>
</compile_context>

<pallas_src>
import functools

import jax
import jax.numpy as jnp
from jax.experimental import pallas as pl
from jax.experimental.pallas import tpu as pltpu


def _h_sigmoid_kernel(x_ref, o_ref):
    x = x_ref[...]
    dt = x.dtype
    three = jnp.asarray(3.0, dt)
    zero = jnp.asarray(0.0, dt)
    six = jnp.asarray(6.0, dt)
    inv6 = jnp.asarray(1.0 / 6.0, dt)
    # relu6(x + 3) / 6
    o_ref[...] = (jnp.clip(x + three, zero, six) * inv6).astype(o_ref.dtype)


def _choose_lanes(n, max_lanes):
    """Largest power-of-two multiple of 128 dividing n, capped at max_lanes (0 if none)."""
    if n % 128 != 0:
        return 0
    lanes = 128
    while lanes * 2 <= max_lanes and n % (lanes * 2) == 0:
        lanes *= 2
    return lanes


@functools.lru_cache(maxsize=1)
def _tpu_config():
    """Return (tensorcores_per_chip, max_block_bytes, vmem_limit_bytes)."""
    kind = ""
    try:
        kind = jax.devices()[0].device_kind.lower()
    except Exception:
        pass
    vmem = None
    try:
        vmem = getattr(pltpu.get_tpu_info(), "vmem_capacity_bytes", None)
    except Exception:
        vmem = None

    mib = 1024 * 1024
    if "v7" in kind or "7x" in kind:
        # 2 TCs, 64 MiB VMEM: 6 MiB blocks * 4 double-buffered slabs = 24 MiB < 32 MiB.
        return 2, 6 * mib, 32 * mib
    if "v6" in kind or "v5e" in kind or "v5 lite" in kind or "v5lite" in kind:
        # 1 TC, 128 MiB VMEM: bigger blocks amortize the ~0.35 us/grid-step overhead.
        return 1, 12 * mib, 64 * mib
    if vmem is not None and vmem <= 80 * mib:
        return 2, 6 * mib, 32 * mib
    # Unknown part (incl. v4/v5p megacore): conservative VMEM, assume 2 cores so we
    # never serialize medium inputs onto one core.
    return 2, 4 * mib, 32 * mib


def _run_pallas_2d(x2d, num_cores, max_block_bytes, vmem_limit_bytes):
    rows, lanes = x2d.shape
    dtype = x2d.dtype
    itemsize = jnp.dtype(dtype).itemsize
    n = rows * lanes

    # Packed-sublane granularity for this dtype: 8 (f32), 16 (bf16/f16), 32 (int8/fp8).
    g = max(8, (8 * 4) // itemsize)

    target_rows = max(g, (max_block_bytes // (lanes * itemsize)) // g * g)
    if rows > target_rows:
        tile_rows = target_rows
    elif num_cores >= 2 and rows >= 4 * g:
        # >= 4 balanced blocks -> >= 2 per TensorCore on v7x, and each core keeps its
        # input/output DMA pipeline 2-deep. Round DOWN so blocks stay balanced.
        tile_rows = max(g, (rows // 4) // g * g)
    else:
        # Single-TC chip (or very small slab): one full-extent block, no pointless split.
        tile_rows = rows

    grid_m = pl.cdiv(rows, tile_rows)

    return pl.pallas_call(
        _h_sigmoid_kernel,
        out_shape=jax.ShapeDtypeStruct((rows, lanes), dtype),
        grid_spec=pltpu.PrefetchScalarGridSpec(
            num_scalar_prefetch=0,
            grid=(grid_m,),
            in_specs=[pl.BlockSpec((tile_rows, lanes), lambda i: (i, 0))],
            out_specs=pl.BlockSpec((tile_rows, lanes), lambda i: (i, 0)),
        ),
        compiler_params=pltpu.CompilerParams(
            # TODO(synk): confirm with xprof that "parallel" shards the grid across both
            # v7x TensorCores; if one TC is idle, switch this axis to pltpu.CORE_PARALLEL.
            dimension_semantics=("parallel",),
            vmem_limit_bytes=vmem_limit_bytes,
        ),
        cost_estimate=pl.CostEstimate(
            flops=3 * n,
            transcendentals=0,
            bytes_accessed=2 * n * itemsize,
        ),
    )(x2d)


def _h_sigmoid_jnp(x):
    dt = x.dtype
    return (jnp.clip(x + jnp.asarray(3.0, dt), jnp.asarray(0.0, dt), jnp.asarray(6.0, dt))
            * jnp.asarray(1.0 / 6.0, dt)).astype(dt)


def h_sigmoid(x, *, max_lanes=2048, min_pallas_bytes=64 * 1024):
    """Elementwise hard-sigmoid matching torch: relu6(x + 3) / 6. Any shape/dtype."""
    orig_shape = x.shape
    dtype = x.dtype
    n = x.size
    itemsize = jnp.dtype(dtype).itemsize

    # Tiny-input fast path: pallas_call launch/grid setup would dominate the work.
    if n == 0 or n * itemsize < min_pallas_bytes:
        return _h_sigmoid_jnp(x)

    num_cores, max_block_bytes, vmem_limit_bytes = _tpu_config()
    flat = x.reshape(-1)

    lanes = _choose_lanes(n, max_lanes)
    if lanes:
        # Common case: element count divisible by 128 -> free reshape to a lane-dense slab.
        out2d = _run_pallas_2d(flat.reshape(n // lanes, lanes),
                               num_cores, max_block_bytes, vmem_limit_bytes)
        return out2d.reshape(orig_shape)

    # Ragged element count: kernel on the multiple-of-128 head, plain jnp on the
    # <=127-element tail. No full-array pad / slice copies.
    n_main = (n // 128) * 128
    head_lanes = _choose_lanes(n_main, max_lanes)
    out_head = _run_pallas_2d(flat[:n_main].reshape(n_main // head_lanes, head_lanes),
                              num_cores, max_block_bytes, vmem_limit_bytes).reshape(-1)
    out_tail = _h_sigmoid_jnp(flat[n_main:])
    return jnp.concatenate([out_head, out_tail]).reshape(orig_shape)


if __name__ == "__main__":
    key = jax.random.PRNGKey(0)
    k1, k2, k3, k4 = jax.random.split(key, 4)

    # 1) Module-scale NCHW input (tiny -> jnp fast path).
    x1 = jax.random.normal(k1, (2, 4, 16, 16), dtype=jnp.float32) * 4.0
    # 2) Larger f32 activation: exercises the Pallas path (lane-dense slab, multi-block grid).
    x2 = jax.random.normal(k2, (2, 32, 32, 32), dtype=jnp.float32) * 4.0
    # 3) Ragged element count (257*129 not a multiple of 128): Pallas head + jnp tail.
    x3 = jax.random.normal(k3, (257, 129), dtype=jnp.float32) * 4.0
    # 4) bf16 activation: exercises the 16-row sublane granularity.
    x4 = (jax.random.normal(k4, (2, 48, 64, 64), dtype=jnp.float32) * 4.0).astype(jnp.bfloat16)

    for x, tol in ((x1, 1e-6), (x2, 1e-6), (x3, 1e-6), (x4, 2e-2)):
        y = jax.block_until_ready(h_sigmoid(x))
        assert y.shape == x.shape and y.dtype == x.dtype
        y_ref = jnp.clip(x + 3.0, 0.0, 6.0) / 6.0  # reference in the input dtype
        err = float(jnp.max(jnp.abs(y.astype(jnp.float32) - y_ref.astype(jnp.float32))))
        assert err <= tol, (x.shape, str(x.dtype), err)

    print("KERNEL_OK")
</pallas_src>

<mosaic_0001>
module attributes {stable_mosaic.version = 11 : i64} {
  func.func @_h_sigmoid_kernel(%arg0: i32, %arg1: memref<8x2048xf32, #tpu.memory_space<vmem>>, %arg2: memref<8x2048xf32, #tpu.memory_space<vmem>>) attributes {dimension_semantics = [#tpu.dimension_semantics<parallel>], iteration_bounds = array<i64: 4>, scalar_prefetch = 0 : i64, scratch_operands = 0 : i64, tpu.core_type = #tpu.core_type<tc>, window_params = [{transform_indices = @transform_0, window_bounds = array<i64: 8, 2048>}, {transform_indices = @transform_1, window_bounds = array<i64: 8, 2048>}]} {
    %c0 = arith.constant 0 : index
    %c0_0 = arith.constant 0 : index
    %0 = vector.load %arg1[%c0, %c0_0] : memref<8x2048xf32, #tpu.memory_space<vmem>>, vector<8x2048xf32>
    %cst = arith.constant 3.000000e+00 : f32
    %1 = vector.broadcast %cst : f32 to vector<8x2048xf32>
    %2 = arith.addf %0, %1 : vector<8x2048xf32>
    %cst_1 = arith.constant 0.000000e+00 : f32
    %cst_2 = arith.constant 6.000000e+00 : f32
    %3 = vector.broadcast %cst_1 : f32 to vector<8x2048xf32>
    %4 = arith.maximumf %3, %2 : vector<8x2048xf32>
    %5 = vector.broadcast %cst_2 : f32 to vector<8x2048xf32>
    %6 = arith.minimumf %5, %4 : vector<8x2048xf32>
    %cst_3 = arith.constant 0.166666672 : f32
    %7 = vector.broadcast %cst_3 : f32 to vector<8x2048xf32>
    %8 = arith.mulf %6, %7 : vector<8x2048xf32>
    %c0_4 = arith.constant 0 : index
    %c0_5 = arith.constant 0 : index
    %9 = vector.load %arg2[%c0_4, %c0_5] : memref<8x2048xf32, #tpu.memory_space<vmem>>, vector<8x2048xf32>
    tpu.vector_store %arg2[%c0_4, %c0_5], %8 {strides = array<i32>} : memref<8x2048xf32, #tpu.memory_space<vmem>>, vector<8x2048xf32>,
    return
  }
  func.func @transform_0(%arg0: i32) -> (i32, i32) {
    %c0_i32 = arith.constant 0 : i32
    %c0_i32_0 = arith.constant 0 : i32
    return %arg0, %c0_i32 : i32, i32
  }
  func.func @transform_1(%arg0: i32) -> (i32, i32) {
    %c0_i32 = arith.constant 0 : i32
    %c0_i32_0 = arith.constant 0 : i32
    return %arg0, %c0_i32 : i32, i32
  }
}

</mosaic_0001>

<bundles_post_ra>
// kernel: tpu_custom_call.1
= control target key start
LH: loop header
LB: loop body
LE: loop exit
PB: predicated region body
PF: predicated region fallthrough
CT: control target
= control target key end

     0   :  { %6 = vsyncpa [#allocation3], 0  ;;  %s668_s0 = inlined_call_operand.hbm [shape: f32[32,2048], index: 0, kind: input, shape index: {}]   ;;  %s669_s1 = inlined_call_operand.hbm [shape: f32[32,2048], index: 1, kind: output, shape index: {}]  }
   0x1   :  { %8 = vsyncpa [#allocation3 + $0x1], 0 }
   0x2   :  { %9 = vsyncpa [#allocation4], 0 }
   0x3   :  { %11 = vsyncpa [#allocation4 + $0x1], 0  ;;  %s482_s6 = smov 0   ;;  %s484_s7 = smov 0  }
   0x4   :  { %s486_s8 = smov 0   ;;  %s488_s9 = smov 0  }
   0x5 LB: > { %s503_s10 = sadd.s32 4294967295, %s468_s9   ;;  %s314_s11 = sadd.s32 4294967294, %s468_s9   ;;  %s468_s9 = sphi %s488_s9, %s685_s9   ;;  %s464_s8 = sphi %s486_s8, %s684_s8   ;;  %s460_s7 = sphi %s484_s7, %s683_s7   ;;  %s456_s6 = sphi %s482_s6, %s682_s6  }
   0x6   : > { %s507_s12 = sadd.s32 1, %s468_s9   ;;  %s24_s13 = sadd.s32 1, %s464_s8 }
   0x7   : > { %s21_s14 = ssub.s32 %s468_s9, %s507_s12  ;;  %p31_p0 = scmp.ne.s32.totalorder %s464_s8, %s460_s7 }
   0x8   : > { %p22_p1 = scmp.eq.s32.totalorder %s21_s14, 0  ;;  %p32_p2 = scmp.eq.s32.totalorder %s468_s9, 0 }
   0x9   : > { %p37_p3 = scmp.ne.s32.totalorder %s460_s7, %s456_s6  ;;  %p38_p4 = scmp.eq.s32.totalorder %s503_s10, 0 }
   0xa   : > { %s519_s15 = scalar_select %p22_p1, %s464_s8, %s24_s13  }
   0xb   : > { %p521_p5 = por %p32_p2, %p31_p0  ;;  %p525_p6 = por %p38_p4, %p37_p3 }
   0xc   : > { %p61_p7 = scmp.eq.s32.totalorder %s503_s10, 3  ;;  %p67_p8 = scmp.eq.s32.totalorder %s314_s11, 3 }
   0xd   : > { %s673_s17 = scalar_select %p525_p6, 1, 0 }
   0xe   : > { %p342_p9 = scmp.lt.s32.totalorder %s468_s9, 4  ;;  %p531_p10 = por %p61_p7, %p31_p0 }
   0xf   : > { %p535_p11 = por %p67_p8, %p37_p3  ;;  %s87_s20 = sand.u32 1, %s464_s8  }
  0x10   : > { %s674_s18 = scalar_select %p531_p10, 1, 0 }
  0x11   : > { %s675_s19 = scalar_select %p535_p11, 1, 0 }
  0x12   : > { %s328_s21 = sshll.u32 %s468_s9, 11  ;;  %s317_s22 = sshll.u32 %s87_s20, 7 }
  0x13   : > { %s544_s25 = scalar_lea.hbm %s668_s0, %s328_s21  ;;  %s91_s26 = scalar_lea.vmem [#allocation2], %s317_s22 }
  0x14   : > { %s99_s27 = sshll.u32 %s91_s26, 4  ;;  %p548_p12 = pnand %p342_p9, %p521_p5  ;;  %s552_s27 = int_to_ptr.vmem [resolvable:$true] %s99_s27 }
  0x15   : > { %s88_s29 = scalar_lea.sflag [#allocation3], %s87_s20  ;;  %s376_s30 = scalar_lea.hbm %s544_s25, 2048 }
  0x16   : > { %p377_p1 = scmp.ne.s32.totalorder %s544_s25, %s376_s30  ;;  %p378_p2 = pneg %p548_p12 }
  0x17   : > { %s381_s4 = scalar_lea.hbm %s668_s0, 8192  ;;  %p382_p5 = scmp.lt.s32.totalorder %s544_s25, %s668_s0 }
  0x18   : > { %p379_p3 = pnand %p378_p2, %p377_p1  ;;  %p383_p7 = scmp.lt.s32.totalorder %s381_s4, %s376_s30 }
  0x1a   : > { %p380_p4 = pneg %p379_p3  ;;  %p384_p8 = por %p383_p7, %p382_p5 }
  0x1c   : > { %p385_p9 = pnand %p384_p8, %p380_p4 }
  0x1e   : > { %388 = shalt.err (!%p385_p9)
}
  0x1f   : > { %s389_s13 = scalar_lea.vmem %s552_s27, 2048  ;;  %s470_s14 = smov [#allocation2]  }
  0x20   : > { %p390_p13 = scmp.ne.s32.totalorder %s552_s27, %s389_s13  ;;  %s394_s16 = sshll.u32 %s470_s14, 4  ;;  %s395_s16 = int_to_ptr.vmem [resolvable:$false] %s394_s16 }
  0x21   : > { %s396_s20 = scalar_lea.vmem %s395_s16, 4096  ;;  %p397_p3 = scmp.lt.s32.totalorder %s552_s27, %s395_s16 }
  0x22   : > { %p392_p0 = pnand %p390_p13, %p378_p2  ;;  %p398_p11 = scmp.lt.s32.totalorder %s396_s20, %s389_s13 }
  0x24   : > { %p393_p1 = pneg %p392_p0  ;;  %p399_p10 = por %p398_p11, %p397_p3 }
  0x26   : > { %p400_p6 = pnand %p399_p10, %p393_p1 }
  0x28   : > { %403 = shalt.err (!%p400_p6)
}
  0x29   : > { %337 = dma.hbm_to_vmem [thread:$0]  (!%p548_p12), %s544_s25, 2048, %s552_s27, %s88_s29  }
  0x2a   : > { %p677_p4 = scmp.lt.s32.totalorder %s468_s9, 5  ;;  %p678_p5 = scmp.ge.s32.totalorder %s468_s9, 1 }
  0x2c   : > { %p105_p13 = pnand %p678_p5, %p677_p4 }
  0x2d   : > { %s579_s21 = sand.u32 (!%p105_p13), 1, %s460_s7   ;;  %p679_p6 = scmp.ne.s32.totalorder (!%p105_p13), %s673_s17, 0 }
  0x2e   : > { %108 = sbr.rel (%p105_p13) target bundleno = 89 (0x59), region = 24  ;;  %s321_s22 = sshll.u32 (!%p105_p13), %s579_s21, 7 }
  0x2f   : > { %s111_s23 = scalar_lea.sflag (!%p105_p13), [#allocation3], %s579_s21  ;;  %s585_s24 = scalar_lea.vmem (!%p105_p13), [#allocation2], %s321_s22 }
  0x33   : > { %447 = dma.done.wait (%p679_p6), %s111_s23, 2048  }
  0x34   : > { %449 = vsyncadd (%p679_p6), %s111_s23, 4294965248  ;;  %v133_v0 = vld [vmem:[%s585_s24] sm:$0xff]  ;;  %v134_v1 = vld [vmem:[%s585_s24 + $0x8] sm:$0xff]  ;;  %s607_s17 = scalar_lea.vmem [#allocation5], %s321_s22  ;;  %s329_s25 = sshll.u32 %s503_s10, 11 }
  0x35   : > { %v135_v2 = vld [vmem:[%s585_s24 + $0x10] sm:$0xff]  ;;  %v149_v3 = vadd.f32 3.0, %v133_v0  ;;  %v150_v4 = vadd.f32 3.0, %v134_v1  ;;  %v136_v6 = vld [vmem:[%s585_s24 + $0x18] sm:$0xff]  ;;  %v137_v7 = vld [vmem:[%s585_s24 + $0x20] sm:$0xff]  ;;  %s244_s26 = sshll.u32 %s607_s17, 4  ;;  %s630_s28 = scalar_lea.hbm %s669_s1, %s329_s25  ;;  %s245_s26 = int_to_ptr.vmem [resolvable:$true] %s244_s26 }
  0x36   : > { %v151_v5 = vadd.f32 3.0, %v135_v2  ;;  %v138_v8 = vld [vmem:[%s585_s24 + $0x28] sm:$0xff]  ;;  %v152_v9 = vadd.f32 3.0, %v136_v6  ;;  %v153_v10 = vadd.f32 3.0, %v137_v7  ;;  %v139_v12 = vld [vmem:[%s585_s24 + $0x30] sm:$0xff]  ;;  %v140_v13 = vld [vmem:[%s585_s24 + $0x38] sm:$0xff] }
  0x37   : > { %v154_v11 = vadd.f32 3.0, %v138_v8  ;;  %v165_v14 = vmax.f32 %v149_v3, 0.0  ;;  %v166_v15 = vmax.f32 %v150_v4, 0.0  ;;  %v155_v17 = vadd.f32 3.0, %v139_v12  ;;  %v141_v22 = vld [vmem:[%s585_s24 + $0x40] sm:$0xff]  ;;  %v142_v23 = vld [vmem:[%s585_s24 + $0x48] sm:$0xff] }
  0x38   : > { %v167_v16 = vmax.f32 %v151_v5, 0.0  ;;  %v168_v18 = vmax.f32 %v152_v9, 0.0  ;;  %v169_v19 = vmax.f32 %v153_v10, 0.0  ;;  %v156_v21 = vadd.f32 3.0, %v140_v13  ;;  %v143_v28 = vld [vmem:[%s585_s24 + $0x50] sm:$0xff]  ;;  %v144_v29 = vld [vmem:[%s585_s24 + $0x58] sm:$0xff] }
  0x39   : > { %v170_v20 = vmax.f32 %v154_v11, 0.0  ;;  %v181_v24 = vmin.f32 %v165_v14, 6.0  ;;  %v182_v25 = vmin.f32 %v166_v15, 6.0  ;;  %v171_v27 = vmax.f32 %v155_v17, 0.0  ;;  %v145_v34 = vld [vmem:[%s585_s24 + $0x60] sm:$0xff]  ;;  %v146_v35 = vld [vmem:[%s585_s24 + $0x68] sm:$0xff] }
  0x3a   : > { %v183_v26 = vmin.f32 %v167_v16, 6.0  ;;  %v184_v30 = vmin.f32 %v168_v18, 6.0  ;;  %v185_v31 = vmin.f32 %v169_v19, 6.0  ;;  %v172_v33 = vmax.f32 %v156_v21, 0.0  ;;  %v147_v50 = vld [vmem:[%s585_s24 + $0x70] sm:$0xff]  ;;  %v148_v51 = vld [vmem:[%s585_s24 + $0x78] sm:$0xff] }
  0x3b   : > { %v186_v32 = vmin.f32 %v170_v20, 6.0  ;;  %v197_v36 = vmul.f32 0.16666667, %v181_v24  ;;  %v198_v37 = vmul.f32 0.16666667, %v182_v25  ;;  %v187_v42 = vmin.f32 %v171_v27, 6.0 }
  0x3c   : > { %v199_v38 = vmul.f32 0.16666667, %v183_v26  ;;  %v200_v39 = vmul.f32 0.16666667, %v184_v30  ;;  %v201_v40 = vmul.f32 0.16666667, %v185_v31 }
  0x3d   : > { %v202_v41 = vmul.f32 0.16666667, %v186_v32  ;;  %213 = vst [vmem:[%s607_s17] sm:$0xff] %v197_v36  ;;  %214 = vst [vmem:[%s607_s17 + $0x8] sm:$0xff] %v198_v37  ;;  %v188_v43 = vmin.f32 %v172_v33, 6.0  ;;  %v157_v44 = vadd.f32 3.0, %v141_v22  ;;  %v158_v45 = vadd.f32 3.0, %v142_v23 }
  0x3e   : > { %215 = vst [vmem:[%s607_s17 + $0x10] sm:$0xff] %v199_v38  ;;  %216 = vst [vmem:[%s607_s17 + $0x18] sm:$0xff] %v200_v39  ;;  %v159_v46 = vadd.f32 3.0, %v143_v28  ;;  %v160_v47 = vadd.f32 3.0, %v144_v29  ;;  %v161_v48 = vadd.f32 3.0, %v145_v34  ;;  %v162_v49 = vadd.f32 3.0, %v146_v35 }
  0x3f   : > { %217 = vst [vmem:[%s607_s17 + $0x20] sm:$0xff] %v201_v40  ;;  %218 = vst [vmem:[%s607_s17 + $0x28] sm:$0xff] %v202_v41  ;;  %v203_v52 = vmul.f32 0.16666667, %v187_v42  ;;  %v204_v53 = vmul.f32 0.16666667, %v188_v43 }
  0x40   : > { %v173_v54 = vmax.f32 %v157_v44, 0.0  ;;  %v174_v55 = vmax.f32 %v158_v45, 0.0  ;;  %v175_v56 = vmax.f32 %v159_v46, 0.0  ;;  %v176_v57 = vmax.f32 %v160_v47, 0.0  ;;  %s230_s29 = scalar_lea.sflag [#allocation4], %s579_s21  ;;  %s404_s30 = scalar_lea.vmem %s245_s26, 2048 }
  0x41   : > { %v177_v58 = vmax.f32 %v161_v48, 0.0  ;;  %v178_v59 = vmax.f32 %v162_v49, 0.0  ;;  %219 = vst [vmem:[%s607_s17 + $0x30] sm:$0xff] %v203_v52  ;;  %220 = vst [vmem:[%s607_s17 + $0x38] sm:$0xff] %v204_v53  ;;  %v163_v62 = vadd.f32 3.0, %v147_v50  ;;  %v164_v63 = vadd.f32 3.0, %v148_v51  ;;  %p405_p10 = scmp.ne.s32.totalorder %s245_s26, %s404_s30 }
  0x42   : > { %v189_v60 = vmin.f32 %v173_v54, 6.0  ;;  %v190_v61 = vmin.f32 %v174_v55, 6.0  ;;  %v191_v0 = vmin.f32 %v175_v56, 6.0  ;;  %v192_v1 = vmin.f32 %v176_v57, 6.0  ;;  %p680_p11 = scmp.ne.s32.totalorder %s674_s18, 0  ;;  %s471_s2 = smov [#allocation5]  }
  0x43   : > { %v193_v2 = vmin.f32 %v177_v58, 6.0  ;;  %v194_v3 = vmin.f32 %v178_v59, 6.0  ;;  %v179_v6 = vmax.f32 %v163_v62, 0.0  ;;  %v180_v7 = vmax.f32 %v164_v63, 0.0  ;;  %s408_s3 = sshll.u32 %s471_s2, 4  ;;  %s409_s3 = int_to_ptr.vmem [resolvable:$false] %s408_s3 }
  0x44   : > { %v205_v4 = vmul.f32 0.16666667, %v189_v60  ;;  %v206_v5 = vmul.f32 0.16666667, %v190_v61  ;;  %v207_v8 = vmul.f32 0.16666667, %v191_v0  ;;  %p406_p12 = pnand %p405_p10, %p680_p11  ;;  %p411_p2 = scmp.lt.s32.totalorder %s245_s26, %s409_s3 }
  0x45   : > { %v208_v9 = vmul.f32 0.16666667, %v192_v1  ;;  %v209_v10 = vmul.f32 0.16666667, %v193_v2  ;;  %v210_v11 = vmul.f32 0.16666667, %v194_v3 }
  0x46   : > { %221 = vst [vmem:[%s607_s17 + $0x40] sm:$0xff] %v205_v4  ;;  %222 = vst [vmem:[%s607_s17 + $0x48] sm:$0xff] %v206_v5  ;;  %v195_v12 = vmin.f32 %v179_v6, 6.0  ;;  %v196_v13 = vmin.f32 %v180_v7, 6.0  ;;  %p407_p0 = pneg %p406_p12  ;;  %s410_s4 = scalar_lea.vmem %s409_s3, 4096 }
  0x47   : > { %223 = vst [vmem:[%s607_s17 + $0x50] sm:$0xff] %v207_v8  ;;  %224 = vst [vmem:[%s607_s17 + $0x58] sm:$0xff] %v208_v9  ;;  %p412_p7 = scmp.lt.s32.totalorder %s410_s4, %s404_s30 }
  0x48   : > { %225 = vst [vmem:[%s607_s17 + $0x60] sm:$0xff] %v209_v10  ;;  %226 = vst [vmem:[%s607_s17 + $0x68] sm:$0xff] %v210_v11  ;;  %v211_v14 = vmul.f32 0.16666667, %v195_v12  ;;  %v212_v15 = vmul.f32 0.16666667, %v196_v13 }
  0x49   : > { %p413_p8 = por %p412_p7, %p411_p2 }
  0x4a   : > { %227 = vst [vmem:[%s607_s17 + $0x70] sm:$0xff] %v211_v14  ;;  %228 = vst [vmem:[%s607_s17 + $0x78] sm:$0xff] %v212_v15 }
  0x4b   : > { %p414_p9 = pnand %p413_p8, %p407_p0 }
  0x4d   : > { %417 = shalt.err (!%p414_p9)
}
  0x4e   : > { %s418_s5 = scalar_lea.hbm %s630_s28, 2048  ;;  %s422_s14 = scalar_lea.hbm %s669_s1, 8192 }
  0x4f   : > { %p419_p1 = scmp.ne.s32.totalorder %s630_s28, %s418_s5  ;;  %p423_p5 = scmp.lt.s32.totalorder %s630_s28, %s669_s1 }
  0x50   : > { %p424_p13 = scmp.lt.s32.totalorder %s422_s14, %s418_s5 }
  0x51   : > { %p420_p3 = pnand %p419_p1, %p680_p11 }
  0x52   : > { %p425_p6 = por %p424_p13, %p423_p5 }
  0x53   : > { %p421_p4 = pneg %p420_p3 }
  0x55   : > { %p426_p10 = pnand %p425_p6, %p421_p4 }
  0x57   : > { %429 = shalt.err (!%p426_p10)
}
  0x58   : > { %332 = dma.vmem_to_hbm [thread:$0]  (%p680_p11), %s245_s26, 2048, %s630_s28, %s230_s29  }
  0x59 PF: > { %p343_p12 = scmp.ge.s32.totalorder %s468_s9, 2  ;;  %s256_s21 = sand.u32 1, %s456_s6  }
  0x5a   : > { %p681_p0 = scmp.ne.s32.totalorder %s675_s19, 0  ;;  %s257_s22 = scalar_lea.sflag [#allocation4], %s256_s21 }
  0x5c   : > { %p339_p2 = pnand %p343_p12, %p681_p0 }
  0x5e   : > { %p340_p7 = pneg %p339_p2 }
  0x60   : > { %451 = dma.done.wait (%p340_p7), %s257_s22, 2048  }
  0x61   : > { %453 = vsyncadd (%p340_p7), %s257_s22, 4294965248  ;;  %p14_p8 = scmp.ge.s32.totalorder %s507_s12, 6   ;;  %s682_s6 = smov %s460_s7 }
  0x62   : > { %s683_s7 = smov %s464_s8  ;;  %s684_s8 = smov %s519_s15 }
  0x63   : > { %s685_s9 = smov %s507_s12  ;;  %16 = sbr.rel (!%p14_p8) target bundleno = 5 (0x5), region = 69 }
  0x68   :  { %262 = vsyncpa [#allocation3], 1 }
  0x69   :  { %264 = vsyncpa [#allocation3 + $0x1], 1 }
  0x6a   :  { %265 = vsyncpa [#allocation4], 1 }
  0x6b   :  { %267 = vsyncpa [#allocation4 + $0x1], 1 }

</bundles_post_ra>
